<compile_context>
chip_gen: v7x
topology: tpu7x:2x2x1
jax: 0.10.0
libtpu: 0.0.40
codegen_flags: <defaults>
</compile_context>

<pallas_src>
import functools
import math

import jax
import jax.numpy as jnp
from jax.experimental import pallas as pl
from jax.experimental.pallas import tpu as pltpu

_INV_SQRT2 = 1.0 / math.sqrt(2.0)

# Roofline-derived row-tile targets per TPU generation (rows per MXU tile).
_TM_TARGETS = {4: 512, 5: 384, 6: 1024, 7: 512}


def _ffn_kernel(x_ref, w1_ref, b1_ref, w2_ref, b2_ref, o_ref, *maybe_acc):
    # x_ref:  (tm, dm)      w1_ref: (dm, tk)   b1_ref: (1, tk)
    # w2_ref: (tk, dm)      b2_ref: (1, dm)    o_ref:  (tm, dm)
    # maybe_acc: optional (tm, dm) f32 scratch (only when output dtype != f32)
    acc_ref = maybe_acc[0] if maybe_acc else o_ref
    k = pl.program_id(1)

    @pl.when(k == 0)
    def _init():
        # Fold the fc_2 bias in exactly once.
        acc_ref[...] = jnp.broadcast_to(
            b2_ref[...].astype(acc_ref.dtype), acc_ref.shape)

    # fc_1 partial (hidden columns [k*tk, (k+1)*tk)); MXU in native dtype, f32 acc.
    h = jnp.dot(x_ref[...], w1_ref[...], preferred_element_type=jnp.float32)
    h = h + b1_ref[...].astype(jnp.float32)

    # Exact (erf-based) GELU in f32, matching torch.nn.functional.gelu default.
    h = 0.5 * h * (1.0 + jax.lax.erf(h * jnp.float32(_INV_SQRT2)))

    # TODO(synk): dropout is identity in eval mode; training-mode RNG masking
    # (pltpu.prng_seed + prng_random_bits) omitted.

    # fc_2 partial contraction over this d_ff slice; feed MXU in the weight dtype.
    acc_ref[...] += jnp.dot(h.astype(w2_ref.dtype), w2_ref[...],
                            preferred_element_type=jnp.float32).astype(acc_ref.dtype)

    if maybe_acc:  # trace-time flag: only the scratch path needs a final cast+store
        @pl.when(k == pl.num_programs(1) - 1)
        def _finalize():
            o_ref[...] = acc_ref[...].astype(o_ref.dtype)


def _round_up(x, m):
    return (x + m - 1) // m * m


def _sublane_multiple(dtype):
    # packed sub-32-bit dtypes need taller sublane multiples (bf16 -> 16, int8 -> 32)
    return max(8, 32 // jnp.dtype(dtype).itemsize)


def _device_info():
    """(generation, per-core VMEM bytes); conservative fallbacks if query fails."""
    kind = ""
    try:
        kind = jax.devices()[0].device_kind.lower()
    except Exception:
        pass
    if "v4" in kind or "v3" in kind or "v2" in kind:
        gen = 4
    elif "v5" in kind:
        gen = 5
    elif "v6" in kind:
        gen = 6
    elif "v7" in kind or "7x" in kind:
        gen = 7
    else:
        gen = 6
    vmem = None
    try:
        vmem = int(pltpu.get_tpu_info().vmem_capacity_bytes)
    except Exception:
        vmem = None
    if vmem is None or vmem <= 0:
        vmem = (64 << 20) if gen >= 7 else (128 << 20)
    return gen, vmem


def _pick_row_tile(m, target, sublane):
    if m <= target:
        return _round_up(m, sublane)
    n_tiles = -(-m // target)                       # minimize padding waste
    return _round_up(-(-m // n_tiles), sublane)


def _pick_k_tile(d_ff, target):
    """Returns (tk, d_ff_padded) with d_ff_padded % tk == 0 and tk <= ~target."""
    if d_ff <= target:
        return d_ff, d_ff
    t = (target // 128) * 128
    while t >= 128:
        if d_ff % t == 0:
            return t, d_ff                          # clean 128-multiple divisor
        t -= 128
    # No clean divisor: zero-pad d_ff (padded hidden cols contribute exactly 0).
    tk = (target // 128) * 128
    return tk, _round_up(d_ff, tk)


@jax.jit
def feed_forward_sec(x, w1, b1, w2, b2):
    """x: (B, S, d_model). w1: (d_model, d_ff), w2: (d_ff, d_model). Returns (B, S, d_model)."""
    B, S, d_model = x.shape
    d_ff = w1.shape[1]
    M = B * S

    gen, vmem_cap = _device_info()
    out_dtype = x.dtype
    x_itm = jnp.dtype(x.dtype).itemsize
    w_itm = jnp.dtype(w1.dtype).itemsize
    sub = _sublane_multiple(x.dtype)
    use_scratch = jnp.dtype(out_dtype) != jnp.dtype(jnp.float32)

    # Lane-dense output: pad d_model to a multiple of 128 (sliced off afterwards).
    dm_pad = _round_up(d_model, 128)
    tk, d_ff_pad = _pick_k_tile(d_ff, 512)
    tm = _pick_row_tile(M, _TM_TARGETS.get(gen, 768), sub)

    # v7x megacore: keep >= 2 row tiles so both TensorCores get work.
    if gen >= 7 and M <= tm and M >= 512:
        tm = _round_up((M + 1) // 2, sub)

    # VMEM-budget-aware shrink (never exceed the chip's per-core VMEM; v7x = 64 MiB).
    vmem_budget = min(int(vmem_cap * 0.8), 100 << 20)
    x_bufs = 1 if gen >= 7 else 2                   # x block is k-invariant; single-buffer on v7x

    def _vmem_est(tm_, tk_):
        v = x_bufs * tm_ * dm_pad * x_itm           # x tile
        v += 2 * dm_pad * tk_ * w_itm               # W1 slice (double-buffered)
        v += 2 * tk_ * dm_pad * w_itm               # W2 slice (double-buffered)
        v += 2 * 8 * tk_ * w_itm                    # b1 slice (sublane-padded)
        v += 2 * 8 * dm_pad * w_itm                 # b2
        v += 2 * tm_ * dm_pad * x_itm               # output tile
        if use_scratch:
            v += tm_ * dm_pad * 4                   # f32 accumulator scratch
        return v

    while tm > sub and _vmem_est(tm, tk) > vmem_budget:
        tm = max(sub, _round_up(tm // 2, sub))

    M_pad = _round_up(M, tm)
    vmem_limit = int(min(max(_vmem_est(tm, tk) + (8 << 20), 32 << 20), vmem_budget))

    # --- zero-padding (all mathematically inert, sliced/ignored afterwards) ---
    pad_m, pad_d, pad_f = M_pad - M, dm_pad - d_model, d_ff_pad - d_ff
    x2d = x.reshape(M, d_model)
    if pad_m or pad_d:
        x2d = jnp.pad(x2d, ((0, pad_m), (0, pad_d)))
    w1p = jnp.pad(w1, ((0, pad_d), (0, pad_f))) if (pad_d or pad_f) else w1
    b1p = jnp.pad(b1, ((0, pad_f),)) if pad_f else b1
    w2p = jnp.pad(w2, ((0, pad_f), (0, pad_d))) if (pad_f or pad_d) else w2
    b2p = jnp.pad(b2, ((0, pad_d),)) if pad_d else b2
    b1_2d = b1p.reshape(1, d_ff_pad)
    b2_2d = b2p.reshape(1, dm_pad)

    n_row_tiles = M_pad // tm
    cost = pl.CostEstimate(
        flops=4 * M_pad * dm_pad * d_ff_pad,                   # two matmuls
        transcendentals=M_pad * d_ff_pad,                      # erf over hidden layer
        bytes_accessed=(2 * M_pad * dm_pad * x_itm             # x read + out write
                        + n_row_tiles * (2 * dm_pad * d_ff_pad + d_ff_pad + dm_pad) * w_itm),
    )

    x_index = lambda i, k: (i, 0)
    x_spec = pl.BlockSpec((tm, dm_pad), x_index)
    if gen >= 7:
        # k-invariant x block: single-buffer on v7x to free VMEM for bigger tiles.
        try:
            x_spec = pl.BlockSpec((tm, dm_pad), x_index,
                                  pipeline_mode=pl.Buffered(buffer_count=1))
        except Exception:
            x_spec = pl.BlockSpec((tm, dm_pad), x_index)

    scratch = [pltpu.VMEM((tm, dm_pad), jnp.float32)] if use_scratch else []

    out2d = pl.pallas_call(
        _ffn_kernel,
        out_shape=jax.ShapeDtypeStruct((M_pad, dm_pad), out_dtype),
        grid_spec=pltpu.PrefetchScalarGridSpec(
            num_scalar_prefetch=0,
            grid=(M_pad // tm, d_ff_pad // tk),                # reduction axis last
            in_specs=[
                x_spec,                                         # x row tile
                pl.BlockSpec((dm_pad, tk), lambda i, k: (0, k)),  # W1 column slice
                pl.BlockSpec((1, tk),      lambda i, k: (0, k)),  # b1 slice
                pl.BlockSpec((tk, dm_pad), lambda i, k: (k, 0)),  # W2 row slice
                pl.BlockSpec((1, dm_pad),  lambda i, k: (0, 0)),  # b2 (grid-invariant)
            ],
            out_specs=pl.BlockSpec((tm, dm_pad), lambda i, k: (i, 0)),
            scratch_shapes=scratch,
        ),
        compiler_params=pltpu.CompilerParams(
            dimension_semantics=("parallel", "arbitrary"),
            vmem_limit_bytes=vmem_limit,
        ),
        cost_estimate=cost,
    )(x2d, w1p, b1_2d, w2p, b2_2d)

    out2d = out2d[:M, :d_model]
    return out2d.reshape(B, S, d_model)


def init_params(key, d_model, d_ff, dtype=jnp.float32):
    """Deterministic init mimicking nn.Linear's uniform(-1/sqrt(fan_in), +1/sqrt(fan_in))."""
    k1, k2, k3, k4 = jax.random.split(key, 4)
    bound1 = 1.0 / math.sqrt(d_model)
    bound2 = 1.0 / math.sqrt(d_ff)
    # Stored as (in_features, out_features): transpose of PyTorch's (out, in) layout.
    w1 = jax.random.uniform(k1, (d_model, d_ff), dtype, -bound1, bound1)
    b1 = jax.random.uniform(k2, (d_ff,), dtype, -bound1, bound1)
    w2 = jax.random.uniform(k3, (d_ff, d_model), dtype, -bound2, bound2)
    b2 = jax.random.uniform(k4, (d_model,), dtype, -bound2, bound2)
    return w1, b1, w2, b2


def _reference(x, w1, b1, w2, b2):
    h = jnp.dot(x, w1, precision=jax.lax.Precision.HIGHEST) + b1
    h = 0.5 * h * (1.0 + jax.lax.erf(h * jnp.asarray(_INV_SQRT2, h.dtype)))
    return jnp.dot(h, w2, precision=jax.lax.Precision.HIGHEST) + b2


if __name__ == "__main__":
    key = jax.random.PRNGKey(0)
    kx, kp, kx2, kp2, kx3, kp3 = jax.random.split(key, 6)

    # 1) Small toy shapes matching the module (single-tile path; d_model padded to 128).
    B, S, d_model, d_ff = 2, 8, 32, 64
    x = jax.random.normal(kx, (B, S, d_model), jnp.float32)
    w1, b1, w2, b2 = init_params(kp, d_model, d_ff)
    out = jax.block_until_ready(feed_forward_sec(x, w1, b1, w2, b2))
    ref = _reference(x, w1, b1, w2, b2)
    assert out.shape == (B, S, d_model)
    assert jnp.allclose(out, ref, atol=1e-4, rtol=1e-4), "mismatch vs reference (small)"

    # 2) Row-tile x d_ff-reduction grid path (f32 -> accumulates directly in o_ref).
    B2, S2, d_model2, d_ff2 = 2, 256, 128, 1024
    x2 = jax.random.normal(kx2, (B2, S2, d_model2), jnp.float32)
    p2 = init_params(kp2, d_model2, d_ff2)
    out2 = jax.block_until_ready(feed_forward_sec(x2, *p2))
    ref2 = _reference(x2, *p2)
    assert out2.shape == (B2, S2, d_model2)
    assert jnp.allclose(out2, ref2, atol=1e-2, rtol=1e-2), "mismatch vs reference (tiled)"

    # 3) bf16 path (exercises the f32 scratch accumulator + d_model padding).
    B3, S3, d_model3, d_ff3 = 2, 16, 64, 192
    x3 = jax.random.normal(kx3, (B3, S3, d_model3), jnp.float32).astype(jnp.bfloat16)
    p3 = [p.astype(jnp.bfloat16) for p in init_params(kp3, d_model3, d_ff3)]
    out3 = jax.block_until_ready(feed_forward_sec(x3, *p3))
    ref3 = _reference(x3.astype(jnp.float32), *[p.astype(jnp.float32) for p in p3])
    assert out3.shape == (B3, S3, d_model3)
    assert jnp.allclose(out3.astype(jnp.float32), ref3, atol=5e-2, rtol=5e-2), \
        "mismatch vs reference (bf16)"

    print("KERNEL_OK")
</pallas_src>

<mosaic_0001>
module attributes {stable_mosaic.version = 11 : i64} {
  func.func @_ffn_kernel(%arg0: i32, %arg1: i32, %arg2: memref<16x128xf32, #tpu.memory_space<vmem>>, %arg3: memref<128x64xf32, #tpu.memory_space<vmem>>, %arg4: memref<1x64xf32, #tpu.memory_space<vmem>>, %arg5: memref<64x128xf32, #tpu.memory_space<vmem>>, %arg6: memref<1x128xf32, #tpu.memory_space<vmem>>, %arg7: memref<16x128xf32, #tpu.memory_space<vmem>>) attributes {dimension_semantics = [#tpu.dimension_semantics<parallel>, #tpu.dimension_semantics<arbitrary>], iteration_bounds = array<i64: 1, 1>, scalar_prefetch = 0 : i64, scratch_operands = 0 : i64, tpu.core_type = #tpu.core_type<tc>, window_params = [{transform_indices = @transform_0, window_bounds = array<i64: 16, 128>}, {transform_indices = @transform_1, window_bounds = array<i64: 128, 64>}, {transform_indices = @transform_2, window_bounds = array<i64: 1, 64>}, {transform_indices = @transform_3, window_bounds = array<i64: 64, 128>}, {pipeline_mode = #tpu.pipeline_mode<synchronous>, transform_indices = @transform_4, window_bounds = array<i64: 1, 128>}, {transform_indices = @transform_5, window_bounds = array<i64: 16, 128>}]} {
    %c0_i32 = arith.constant 0 : i32
    %0 = arith.cmpi eq, %arg1, %c0_i32 : i32
    %1 = arith.extui %0 : i1 to i32
    %c0_i32_0 = arith.constant 0 : i32
    %2 = arith.cmpi ne, %1, %c0_i32_0 : i32
    scf.if %2 {
      %c0_16 = arith.constant 0 : index
      %c0_17 = arith.constant 0 : index
      %22 = vector.load %arg6[%c0_16, %c0_17] : memref<1x128xf32, #tpu.memory_space<vmem>>, vector<1x128xf32>
      %23 = vector.shape_cast %22 : vector<1x128xf32> to vector<1x128xf32>
      %24 = vector.broadcast %23 : vector<1x128xf32> to vector<16x128xf32>
      %c0_18 = arith.constant 0 : index
      %c0_19 = arith.constant 0 : index
      %25 = vector.load %arg7[%c0_18, %c0_19] : memref<16x128xf32, #tpu.memory_space<vmem>>, vector<16x128xf32>
      tpu.vector_store %arg7[%c0_18, %c0_19], %24 {strides = array<i32>} : memref<16x128xf32, #tpu.memory_space<vmem>>, vector<16x128xf32>,
    } else {
    }
    %c0 = arith.constant 0 : index
    %c0_1 = arith.constant 0 : index
    %3 = vector.load %arg2[%c0, %c0_1] : memref<16x128xf32, #tpu.memory_space<vmem>>, vector<16x128xf32>
    %c0_2 = arith.constant 0 : index
    %c0_3 = arith.constant 0 : index
    %4 = vector.load %arg3[%c0_2, %c0_3] : memref<128x64xf32, #tpu.memory_space<vmem>>, vector<128x64xf32>
    %cst = arith.constant dense<0.000000e+00> : vector<16x64xf32>
    %5 = tpu.matmul %3, %4, %cst {dimension_numbers = #tpu.dot_dimension_numbers<[1], [0], [0], [1], [0, 0, 1, 1], [], []>} : vector<16x128xf32>, vector<128x64xf32>, vector<16x64xf32> -> vector<16x64xf32>
    %c0_4 = arith.constant 0 : index
    %c0_5 = arith.constant 0 : index
    %6 = vector.load %arg4[%c0_4, %c0_5] : memref<1x64xf32, #tpu.memory_space<vmem>>, vector<1x64xf32>
    %7 = vector.broadcast %6 : vector<1x64xf32> to vector<16x64xf32>
    %8 = arith.addf %5, %7 : vector<16x64xf32>
    %cst_6 = arith.constant 5.000000e-01 : f32
    %9 = vector.broadcast %cst_6 : f32 to vector<16x64xf32>
    %10 = arith.mulf %9, %8 : vector<16x64xf32>
    %cst_7 = arith.constant 0.707106769 : f32
    %11 = vector.broadcast %cst_7 : f32 to vector<16x64xf32>
    %12 = arith.mulf %8, %11 : vector<16x64xf32>
    %13 = math.erf %12 : vector<16x64xf32>
    %cst_8 = arith.constant 1.000000e+00 : f32
    %14 = vector.broadcast %cst_8 : f32 to vector<16x64xf32>
    %15 = arith.addf %14, %13 : vector<16x64xf32>
    %16 = arith.mulf %10, %15 : vector<16x64xf32>
    %c0_9 = arith.constant 0 : index
    %c0_10 = arith.constant 0 : index
    %17 = vector.load %arg7[%c0_9, %c0_10] : memref<16x128xf32, #tpu.memory_space<vmem>>, vector<16x128xf32>
    %c0_11 = arith.constant 0 : index
    %c0_12 = arith.constant 0 : index
    %18 = vector.load %arg5[%c0_11, %c0_12] : memref<64x128xf32, #tpu.memory_space<vmem>>, vector<64x128xf32>
    %cst_13 = arith.constant dense<0.000000e+00> : vector<16x128xf32>
    %19 = tpu.matmul %16, %18, %cst_13 {dimension_numbers = #tpu.dot_dimension_numbers<[1], [0], [0], [1], [0, 0, 1, 1], [], []>} : vector<16x64xf32>, vector<64x128xf32>, vector<16x128xf32> -> vector<16x128xf32>
    %20 = arith.addf %17, %19 : vector<16x128xf32>
    %c0_14 = arith.constant 0 : index
    %c0_15 = arith.constant 0 : index
    %21 = vector.load %arg7[%c0_14, %c0_15] : memref<16x128xf32, #tpu.memory_space<vmem>>, vector<16x128xf32>
    tpu.vector_store %arg7[%c0_14, %c0_15], %20 {strides = array<i32>} : memref<16x128xf32, #tpu.memory_space<vmem>>, vector<16x128xf32>,
    return
  }
  func.func @transform_0(%arg0: i32, %arg1: i32) -> (i32, i32) {
    %c0_i32 = arith.constant 0 : i32
    %c0_i32_0 = arith.constant 0 : i32
    return %arg0, %c0_i32 : i32, i32
  }
  func.func @transform_1(%arg0: i32, %arg1: i32) -> (i32, i32) {
    %c0_i32 = arith.constant 0 : i32
    %c0_i32_0 = arith.constant 0 : i32
    return %c0_i32, %arg1 : i32, i32
  }
  func.func @transform_2(%arg0: i32, %arg1: i32) -> (i32, i32) {
    %c0_i32 = arith.constant 0 : i32
    %c0_i32_0 = arith.constant 0 : i32
    return %c0_i32, %arg1 : i32, i32
  }
  func.func @transform_3(%arg0: i32, %arg1: i32) -> (i32, i32) {
    %c0_i32 = arith.constant 0 : i32
    %c0_i32_0 = arith.constant 0 : i32
    return %arg1, %c0_i32 : i32, i32
  }
  func.func @transform_4(%arg0: i32, %arg1: i32) -> (i32, i32) {
    %c0_i32 = arith.constant 0 : i32
    %c0_i32_0 = arith.constant 0 : i32
    %c0_i32_1 = arith.constant 0 : i32
    return %c0_i32, %c0_i32_0 : i32, i32
  }
  func.func @transform_5(%arg0: i32, %arg1: i32) -> (i32, i32) {
    %c0_i32 = arith.constant 0 : i32
    %c0_i32_0 = arith.constant 0 : i32
    return %arg0, %c0_i32 : i32, i32
  }
}

</mosaic_0001>

<bundles_post_ra>
// kernel: feed_forward_sec.1
= control target key start
LH: loop header
LB: loop body
LE: loop exit
PB: predicated region body
PF: predicated region fallthrough
CT: control target
= control target key end

     0   :  { %vm153_vm0 = vcmask 523264   ;;  %s501_s1 = inlined_call_operand.vmem [shape: f32[128,64], index: 1, kind: input, shape index: {}]   ;;  %s502_s0 = inlined_call_operand.vmem [shape: f32[16,128], index: 0, kind: input, shape index: {}]   ;;  %s503_s3 = inlined_call_operand.vmem [shape: f32[64,128], index: 3, kind: input, shape index: {}]   ;;  %s504_s2 = inlined_call_operand.vmem [shape: f32[1,64], index: 2, kind: input, shape index: {}]   ;;  %s505_s4 = inlined_call_operand.vmem [shape: f32[1,128], index: 4, kind: input, shape index: {}]   ;;  %s506_s5 = inlined_call_operand.vmem [shape: f32[16,128], index: 5, kind: output, shape index: {}]  }
   0x1   :  { %v35_v0 = vld [vmem:[%s501_s1] sm:$0xff]  ;;  %v36_v1 = vld [vmem:[%s501_s1 + $0x8] sm:$0xff]  ;;  %v37_v2 = vld [vmem:[%s501_s1 + $0x10] sm:$0xff] }
   0x2   :  { %v329_v3 = vpack.c.bf16 %v36_v1, %v35_v0  ;;  %v38_v4 = vld [vmem:[%s501_s1 + $0x18] sm:$0xff]  ;;  %v39_v6 = vld [vmem:[%s501_s1 + $0x20] sm:$0xff]  ;;  %v40_v7 = vld [vmem:[%s501_s1 + $0x28] sm:$0xff] }
   0x3   :  { %v333_v5 = vpack.c.bf16 %v38_v4, %v37_v2  ;;  %v337_v8 = vpack.c.bf16 %v40_v7, %v39_v6  ;;  %v33_v9 = vld [vmem:[%s502_s0] sm:$0xff]  ;;  %v41_v10 = vld [vmem:[%s501_s1 + $0x30] sm:$0xff]  ;;  %v42_v11 = vld [vmem:[%s501_s1 + $0x38] sm:$0xff] }
   0x4   :  { %330 = vmatprep.subr.bf16.mxu0 %v329_v3  ;;  %307 = vmatprep.mubr.f32.mxu0 %v33_v9  ;;  %v341_v12 = vpack.c.bf16 %v42_v11, %v41_v10  ;;  %v43_v13 = vld [vmem:[%s501_s1 + $0x40] sm:$0xff]  ;;  %v44_v14 = vld [vmem:[%s501_s1 + $0x48] sm:$0xff]  ;;  %v45_v16 = vld [vmem:[%s501_s1 + $0x50] sm:$0xff] }
   0x5   :  { %332 = vmatpush3.bf16.msra.mxu0 %v329_v3  ;;  %v345_v15 = vpack.c.bf16 %v44_v14, %v43_v13  ;;  %v46_v17 = vld [vmem:[%s501_s1 + $0x58] sm:$0xff]  ;;  %v47_v19 = vld [vmem:[%s501_s1 + $0x60] sm:$0xff]  ;;  %v48_v20 = vld [vmem:[%s501_s1 + $0x68] sm:$0xff] }
   0x6   :  { %334 = vmatprep.subr.bf16.mxu0 %v333_v5  ;;  %v349_v18 = vpack.c.bf16 %v46_v17, %v45_v16  ;;  %v353_v21 = vpack.c.bf16 %v48_v20, %v47_v19  ;;  %v49_v22 = vld [vmem:[%s501_s1 + $0x70] sm:$0xff]  ;;  %v50_v23 = vld [vmem:[%s501_s1 + $0x78] sm:$0xff]  ;;  %v34_v25 = vld [vmem:[%s502_s0 + $0x8] sm:$0xff] }
   0x7   :  { %v357_v24 = vpack.c.bf16 %v50_v23, %v49_v22  ;;  %v145_v26 = vld [vmem:[%s503_s3] sm:$0xff]  ;;  %v146_v27 = vld [vmem:[%s503_s3 + $0x8] sm:$0xff]  ;;  %v147_v29 = vld [vmem:[%s503_s3 + $0x10] sm:$0xff] }
   0x8   :  { %v361_v28 = vpack.c.bf16 %v146_v27, %v145_v26  ;;  %v148_v30 = vld [vmem:[%s503_s3 + $0x18] sm:$0xff]  ;;  %v149_v32 = vld [vmem:[%s503_s3 + $0x20] sm:$0xff]  ;;  %v150_v33 = vld [vmem:[%s503_s3 + $0x28] sm:$0xff] }
   0x9   :  { %336 = vmatpush3.bf16.msra.mxu0 %v333_v5  ;;  %v365_v31 = vpack.c.bf16 %v148_v30, %v147_v29  ;;  %v369_v34 = vpack.c.bf16 %v150_v33, %v149_v32  ;;  %v151_v35 = vld [vmem:[%s503_s3 + $0x30] sm:$0xff]  ;;  %v152_v36 = vld [vmem:[%s503_s3 + $0x38] sm:$0xff]  ;;  %v244_v38 = vld [vmem:[%s504_s2] ss:$0 sm:$0xff] }
   0xa   :  { %338 = vmatprep.subr.bf16.mxu0 %v337_v8  ;;  %362 = vmatprep.subr.bf16.mxu1 %v361_v28  ;;  %v373_v37 = vpack.c.bf16 %v152_v36, %v151_v35  ;;  %v243_v53 = vld [vmem:[%s505_s4] ss:$0 sm:$0xff] }
   0xb   :  { %364 = vmatpush3.bf16.msra.mxu1 %v361_v28 }
   0xc   :  { %366 = vmatprep.subr.bf16.mxu1 %v365_v31 }
   0xd   :  { %340 = vmatpush3.bf16.msra.mxu0 %v337_v8 }
   0xe   :  { %342 = vmatprep.subr.bf16.mxu0 %v341_v12 }
   0xf   :  { %368 = vmatpush3.bf16.msra.mxu1 %v365_v31 }
  0x10   :  { %370 = vmatprep.subr.bf16.mxu1 %v369_v34 }
  0x11   :  { %344 = vmatpush3.bf16.msra.mxu0 %v341_v12 }
  0x12   :  { %346 = vmatprep.subr.bf16.mxu0 %v345_v15 }
  0x13   :  { %372 = vmatpush3.bf16.msra.mxu1 %v369_v34 }
  0x14   :  { %374 = vmatprep.subr.bf16.mxu1 %v373_v37 }
  0x15   :  { %348 = vmatpush3.bf16.msra.mxu0 %v345_v15 }
  0x16   :  { %350 = vmatprep.subr.bf16.mxu0 %v349_v18 }
  0x17   :  { %376 = vmatpush3.bf16.msra.mxu1 %v373_v37 }
  0x19   :  { %352 = vmatpush3.bf16.msra.mxu0 %v349_v18 }
  0x1a   :  { %354 = vmatprep.subr.bf16.mxu0 %v353_v21 }
  0x1d   :  { %356 = vmatpush3.bf16.msra.mxu0 %v353_v21 }
  0x1e   :  { %358 = vmatprep.subr.bf16.mxu0 %v357_v24 }
  0x21   :  { %360 = vmatpush3.bf16.msra.mxu0 %v357_v24 }
  0x24   :  { %308 = vmatmul.mubr.f32.vlgmr.msra.gmra.mrb[0].mxu0 %v34_v25 }
  0xf7   :  { %v309_v39 = vpop.f32.mrb[0].mxu0 }
  0xf8   :  { %v130_v40 = vadd.f32 %v309_v39, %v244_v38  ;;  %v124_v41 = vpop.f32.mrb[1].mxu0 }
  0xf9   :  { %v125_v42 = vadd.f32 %v244_v38, %v124_v41 }
  0xfa   :  { %v136_v43 = vmul.f32 0.70710677, %v130_v40  ;;  %v134_v50 = vmul.f32 0.5, %v130_v40 }
  0xfb   :  { %v135_v44 = vmul.f32 0.70710677, %v125_v42  ;;  %v133_v48 = vmul.f32 0.5, %v125_v42 }
  0xfc   :  { %377 = verf.f32 %v136_v43 }
  0xfd   :  { %379 = verf.f32 %v135_v44 }
 0x106   :  { %v378_v45 = vpop.eup %377 }
 0x107   :  { %v380_v46 = vpop.eup %379  ;;  %v140_v47 = vadd.f32 1.0, %v378_v45 }
 0x108   :  { %v139_v49 = vadd.f32 1.0, %v380_v46 }
 0x109   :  { %v142_v52 = vmul.f32 %v140_v47, %v134_v50 }
 0x10a   :  { %v141_v51 = vmul.f32 %v139_v49, %v133_v48 }
 0x10c   :  { %326 = vmatprep.mubr.msk.f32.mxu1 %vm153_vm0, %v141_v51 }
 0x10d   :  { %327 = vmatmul.mubr.msk.f32.vlgmr.msra.gmra.mrb[0].mxu1 %vm153_vm0, %v142_v52 }
 0x1e0   :  { %v328_v54 = vpop.f32.mrb[0].mxu1 }
 0x1e1   :  { %v236_v55 = vadd.f32 %v328_v54, %v243_v53  ;;  %v226_v56 = vpop.f32.mrb[1].mxu1 }
 0x1e2   :  { %v235_v57 = vadd.f32 %v243_v53, %v226_v56 }
 0x1e3   :  { %238 = vst [vmem:[%s506_s5 + $0x8] sm:$0xff] %v236_v55 }
 0x1e4   :  { %237 = vst [vmem:[%s506_s5] sm:$0xff] %v235_v57 }

</bundles_post_ra>
